<compile_context>
chip_gen: v7x
topology: tpu7x:2x2x1
jax: 0.10.0
libtpu: 0.0.40
codegen_flags: <defaults>
</compile_context>

<pallas_src>
import functools
import math

import numpy as np
import jax
import jax.numpy as jnp
from jax.experimental import pallas as pl
from jax.experimental.pallas import tpu as pltpu


# ---------------------------------------------------------------------------
# Fused kernel: one graph per grid step (batch axis is the parallel grid).
# ---------------------------------------------------------------------------
def gat_kernel(x_ref, adj_ref, w_ref, a_top_ref, a_bot_ref, o_t_ref, o_u_ref,
               fc_w_ref, fc_b_ref, fco_w_ref, fco_b_ref, out_ref, *, concat):
    f32 = jnp.float32
    n = adj_ref.shape[1]                                         # static N

    # Node feature transform (fused former kernel 1):  af = x @ W    -> MXU
    af = jnp.dot(x_ref[0], w_ref[...], preferred_element_type=f32)          # (N, Fout)

    # Pairwise attention logits without materializing atom_trans:
    #   e1[k, :] = (af @ a_top)[idx_t(k)] + (af @ a_bot)[idx_u(k)],  k = i*N + j
    # idx_t/idx_u reproduce torch's cat(dim=1)+view pairing (see wrapper); the
    # gathers are one-hot matmuls so they also run on the MXU.
    t = jnp.dot(af, a_top_ref[...], preferred_element_type=f32)             # (N, E)
    u = jnp.dot(af, a_bot_ref[...], preferred_element_type=f32)             # (N, E)
    g_t = jnp.dot(o_t_ref[...], t, preferred_element_type=f32)              # (N*N, E)
    g_u = jnp.dot(o_u_ref[...], u, preferred_element_type=f32)              # (N*N, E)
    e1 = g_t + g_u                                                           # (N*N, E)

    le = jnp.where(e1 > 0.0, e1, 0.01 * e1)              # LeakyReLU (slope 0.01)
    # fc: E -> 1  (weight broadcast over rows, reduce over the E lane axis).
    weighted = le * fc_w_ref[...]                         # (N*N, E) * (1, E)
    # (N*N, E) -> (N, N, E) keeps the minor dim, so it is a free relayout when
    # N is a multiple of 8 (demo uses N = 8).
    e_mat = jnp.sum(weighted.reshape(n, n, -1), axis=-1) + fc_b_ref[0, 0]    # (N, N)

    # Masked softmax over neighbors (torch dim=2).
    masked = jnp.where(adj_ref[0] > 0.0, e_mat, f32(-9e15))
    m = jnp.max(masked, axis=-1, keepdims=True)
    p = jnp.exp(masked - m)
    inv = pl.reciprocal(jnp.sum(p, axis=-1, keepdims=True), approx=True)
    attn = p * inv
    # TODO(synk): dropout(attention) treated as identity (inference).

    # Aggregate + output projection.
    h1 = jnp.dot(attn, af, preferred_element_type=f32)                       # (N, Fout)
    hn = jnp.dot(h1, fco_w_ref[...], preferred_element_type=f32) + fco_b_ref[...]
    if concat:
        hn = jnp.where(hn > 0.0, hn, jnp.exp(hn) - 1.0)                      # ELU(alpha=1)
    out_ref[0] = hn.astype(out_ref.dtype)


# ---------------------------------------------------------------------------
# Wrapper
# ---------------------------------------------------------------------------
def gat_layer_forward(x, adj, params, *, concat=True):
    W, a, fc_w, fc_b, fco_w, fco_b = params
    B, N, Fin = x.shape
    Fout = W.shape[1]
    E = a.shape[1]

    a_top = a[:Fout]          # (Fout, E)
    a_bot = a[Fout:]          # (Fout, E)

    # Exact index maps of the torch cat(dim=1)+view pairing:
    #   row 2k   of M comes from af[idx_t(k)],  row 2k+1 from af[idx_u(k)].
    k = np.arange(N * N)
    idx_t = np.where(2 * k < N * N, (2 * k) // N, (2 * k) % N)
    idx_u = np.where(2 * k + 1 < N * N, (2 * k + 1) // N, (2 * k + 1) % N)
    o_t = np.zeros((N * N, N), np.float32)
    o_u = np.zeros((N * N, N), np.float32)
    o_t[k, idx_t] = 1.0
    o_u[k, idx_u] = 1.0
    o_t = jnp.asarray(o_t)
    o_u = jnp.asarray(o_u)

    out = pl.pallas_call(
        functools.partial(gat_kernel, concat=concat),
        out_shape=jax.ShapeDtypeStruct((B, N, Fout), jnp.float32),
        grid=(B,),
        in_specs=[
            pl.BlockSpec((1, N, Fin), lambda b: (b, 0, 0)),       # x
            pl.BlockSpec((1, N, N), lambda b: (b, 0, 0)),         # adj
            pl.BlockSpec((Fin, Fout), lambda b: (0, 0)),          # W
            pl.BlockSpec((Fout, E), lambda b: (0, 0)),            # a_top
            pl.BlockSpec((Fout, E), lambda b: (0, 0)),            # a_bot
            pl.BlockSpec((N * N, N), lambda b: (0, 0)),           # gather one-hot (t)
            pl.BlockSpec((N * N, N), lambda b: (0, 0)),           # gather one-hot (u)
            pl.BlockSpec((1, E), lambda b: (0, 0)),               # fc weight
            pl.BlockSpec(memory_space=pltpu.MemorySpace.SMEM),    # fc bias (scalar)
            pl.BlockSpec((Fout, Fout), lambda b: (0, 0)),         # fc_out weight
            pl.BlockSpec((1, Fout), lambda b: (0, 0)),            # fc_out bias
        ],
        out_specs=pl.BlockSpec((1, N, Fout), lambda b: (b, 0, 0)),
        compiler_params=pltpu.CompilerParams(
            dimension_semantics=("parallel",)),
    )(x, adj, W, a_top, a_bot, o_t, o_u, fc_w, fc_b, fco_w, fco_b)
    return out


# ---------------------------------------------------------------------------
# Pure-JAX reference (faithful to the torch ops, incl. the dim=1 concat).
# ---------------------------------------------------------------------------
def gat_reference(x, adj, params, *, concat=True):
    W, a, fc_w, fc_b, fco_w, fco_b = params
    af = x @ W
    B, N, F = af.shape
    a1 = jnp.tile(af, (1, 1, N)).reshape(B, N * N, F)
    a2 = jnp.tile(af, (1, N, 1))
    at = jnp.concatenate([a1, a2], axis=1).reshape(B, N, N, 2 * F)
    e = at @ a
    e = jnp.where(e > 0, e, 0.01 * e)
    e = jnp.einsum("bnme,e->bnm", e, fc_w[0]) + fc_b[0, 0]
    masked = jnp.where(adj > 0, e, jnp.float32(-9e15))
    attn = jax.nn.softmax(masked, axis=2)
    h1 = attn @ af
    hn = h1 @ fco_w + fco_b
    if concat:
        hn = jnp.where(hn > 0, hn, jnp.exp(hn) - 1.0)
    return hn


# ---------------------------------------------------------------------------
# Deterministic parameter init + example run
# ---------------------------------------------------------------------------
def xavier_uniform(key, shape, gain):
    bound = gain * math.sqrt(6.0 / (shape[0] + shape[1]))
    return jax.random.uniform(key, shape, jnp.float32, -bound, bound)


if __name__ == "__main__":
    B, N, Fin, Fout, E = 2, 8, 16, 32, 8   # args.gat_e_out_dim = 8

    key = jax.random.PRNGKey(0)
    ks = jax.random.split(key, 9)

    W = xavier_uniform(ks[0], (Fin, Fout), 1.414)
    a = xavier_uniform(ks[1], (2 * Fout, E), 1.414)
    b_fc = 1.0 / math.sqrt(E)
    fc_w = jax.random.uniform(ks[2], (1, E), jnp.float32, -b_fc, b_fc)        # Linear(E,1).weight
    fc_b = jax.random.uniform(ks[3], (1, 1), jnp.float32, -b_fc, b_fc)        # Linear(E,1).bias
    b_fo = 1.0 / math.sqrt(Fout)
    fco_w = jax.random.uniform(ks[4], (Fout, Fout), jnp.float32, -b_fo, b_fo)  # stored as (in,out)
    fco_b = jax.random.uniform(ks[5], (1, Fout), jnp.float32, -b_fo, b_fo)
    params = (W, a, fc_w, fc_b, fco_w, fco_b)

    x = jax.random.normal(ks[6], (B, N, Fin), jnp.float32)
    adj = (jax.random.uniform(ks[7], (B, N, N)) > 0.5).astype(jnp.float32)
    adj = jnp.maximum(adj, jnp.eye(N, dtype=jnp.float32)[None])

    out = gat_layer_forward(x, adj, params, concat=True)
    out = jax.block_until_ready(out)

    ref = gat_reference(x, adj, params, concat=True)
    assert out.shape == (B, N, Fout)
    # Tolerance accounts for fast (default-precision) MXU passes and the
    # approx EUP reciprocal in the softmax, per the perf review (the previous
    # version forced jax_default_matmul_precision='highest').  A structural
    # bug would produce O(1) errors, far above this threshold.
    assert jnp.allclose(out, ref, rtol=2e-2, atol=5e-2), \
        f"max abs err {jnp.max(jnp.abs(out - ref))}"

    print("KERNEL_OK")
</pallas_src>

<mosaic_0001>
module attributes {stable_mosaic.version = 11 : i64} {
  func.func @gat_kernel(%arg0: i32, %arg1: memref<1x8x16xf32, #tpu.memory_space<vmem>>, %arg2: memref<1x8x8xf32, #tpu.memory_space<vmem>>, %arg3: memref<16x32xf32, #tpu.memory_space<vmem>>, %arg4: memref<32x8xf32, #tpu.memory_space<vmem>>, %arg5: memref<32x8xf32, #tpu.memory_space<vmem>>, %arg6: memref<64x8xf32, #tpu.memory_space<vmem>>, %arg7: memref<64x8xf32, #tpu.memory_space<vmem>>, %arg8: memref<1x8xf32, #tpu.memory_space<vmem>>, %arg9: memref<1x1xf32, #tpu.memory_space<smem>>, %arg10: memref<32x32xf32, #tpu.memory_space<vmem>>, %arg11: memref<1x32xf32, #tpu.memory_space<vmem>>, %arg12: memref<1x8x32xf32, #tpu.memory_space<vmem>>) attributes {dimension_semantics = [#tpu.dimension_semantics<parallel>], iteration_bounds = array<i64: 2>, scalar_prefetch = 0 : i64, scratch_operands = 0 : i64, tpu.core_type = #tpu.core_type<tc>, window_params = [{transform_indices = @transform_0, window_bounds = array<i64: 1, 8, 16>}, {transform_indices = @transform_1, window_bounds = array<i64: 1, 8, 8>}, {pipeline_mode = #tpu.pipeline_mode<synchronous>, transform_indices = @transform_2, window_bounds = array<i64: 16, 32>}, {pipeline_mode = #tpu.pipeline_mode<synchronous>, transform_indices = @transform_3, window_bounds = array<i64: 32, 8>}, {pipeline_mode = #tpu.pipeline_mode<synchronous>, transform_indices = @transform_4, window_bounds = array<i64: 32, 8>}, {pipeline_mode = #tpu.pipeline_mode<synchronous>, transform_indices = @transform_5, window_bounds = array<i64: 64, 8>}, {pipeline_mode = #tpu.pipeline_mode<synchronous>, transform_indices = @transform_6, window_bounds = array<i64: 64, 8>}, {pipeline_mode = #tpu.pipeline_mode<synchronous>, transform_indices = @transform_7, window_bounds = array<i64: 1, 8>}, {transform_indices = @transform_8, window_bounds = array<i64: 1, 1>}, {pipeline_mode = #tpu.pipeline_mode<synchronous>, transform_indices = @transform_9, window_bounds = array<i64: 32, 32>}, {pipeline_mode = #tpu.pipeline_mode<synchronous>, transform_indices = @transform_10, window_bounds = array<i64: 1, 32>}, {transform_indices = @transform_11, window_bounds = array<i64: 1, 8, 32>}]} {
    %c0 = arith.constant 0 : index
    %c0_0 = arith.constant 0 : index
    %c0_1 = arith.constant 0 : index
    %0 = vector.load %arg1[%c0, %c0_0, %c0_1] : memref<1x8x16xf32, #tpu.memory_space<vmem>>, vector<1x8x16xf32>
    %1 = vector.shape_cast %0 : vector<1x8x16xf32> to vector<8x16xf32>
    %c0_2 = arith.constant 0 : index
    %c0_3 = arith.constant 0 : index
    %2 = vector.load %arg3[%c0_2, %c0_3] : memref<16x32xf32, #tpu.memory_space<vmem>>, vector<16x32xf32>
    %cst = arith.constant dense<0.000000e+00> : vector<8x32xf32>
    %3 = tpu.matmul %1, %2, %cst {dimension_numbers = #tpu.dot_dimension_numbers<[1], [0], [0], [1], [0, 0, 1, 1], [], []>} : vector<8x16xf32>, vector<16x32xf32>, vector<8x32xf32> -> vector<8x32xf32>
    %c0_4 = arith.constant 0 : index
    %c0_5 = arith.constant 0 : index
    %4 = vector.load %arg4[%c0_4, %c0_5] : memref<32x8xf32, #tpu.memory_space<vmem>>, vector<32x8xf32>
    %cst_6 = arith.constant dense<0.000000e+00> : vector<8x8xf32>
    %5 = tpu.matmul %3, %4, %cst_6 {dimension_numbers = #tpu.dot_dimension_numbers<[1], [0], [0], [1], [0, 0, 1, 1], [], []>} : vector<8x32xf32>, vector<32x8xf32>, vector<8x8xf32> -> vector<8x8xf32>
    %c0_7 = arith.constant 0 : index
    %c0_8 = arith.constant 0 : index
    %6 = vector.load %arg5[%c0_7, %c0_8] : memref<32x8xf32, #tpu.memory_space<vmem>>, vector<32x8xf32>
    %cst_9 = arith.constant dense<0.000000e+00> : vector<8x8xf32>
    %7 = tpu.matmul %3, %6, %cst_9 {dimension_numbers = #tpu.dot_dimension_numbers<[1], [0], [0], [1], [0, 0, 1, 1], [], []>} : vector<8x32xf32>, vector<32x8xf32>, vector<8x8xf32> -> vector<8x8xf32>
    %c0_10 = arith.constant 0 : index
    %c0_11 = arith.constant 0 : index
    %8 = vector.load %arg6[%c0_10, %c0_11] : memref<64x8xf32, #tpu.memory_space<vmem>>, vector<64x8xf32>
    %cst_12 = arith.constant dense<0.000000e+00> : vector<64x8xf32>
    %9 = tpu.matmul %8, %5, %cst_12 {dimension_numbers = #tpu.dot_dimension_numbers<[1], [0], [0], [1], [0, 0, 1, 1], [], []>} : vector<64x8xf32>, vector<8x8xf32>, vector<64x8xf32> -> vector<64x8xf32>
    %c0_13 = arith.constant 0 : index
    %c0_14 = arith.constant 0 : index
    %10 = vector.load %arg7[%c0_13, %c0_14] : memref<64x8xf32, #tpu.memory_space<vmem>>, vector<64x8xf32>
    %cst_15 = arith.constant dense<0.000000e+00> : vector<64x8xf32>
    %11 = tpu.matmul %10, %7, %cst_15 {dimension_numbers = #tpu.dot_dimension_numbers<[1], [0], [0], [1], [0, 0, 1, 1], [], []>} : vector<64x8xf32>, vector<8x8xf32>, vector<64x8xf32> -> vector<64x8xf32>
    %12 = arith.addf %9, %11 : vector<64x8xf32>
    %cst_16 = arith.constant 0.000000e+00 : f32
    %13 = vector.broadcast %cst_16 : f32 to vector<64x8xf32>
    %14 = arith.cmpf ogt, %12, %13 : vector<64x8xf32>
    %cst_17 = arith.constant 0.00999999977 : f32
    %15 = vector.broadcast %cst_17 : f32 to vector<64x8xf32>
    %16 = arith.mulf %15, %12 : vector<64x8xf32>
    %17 = arith.select %14, %12, %16 : vector<64x8xi1>, vector<64x8xf32>
    %c0_18 = arith.constant 0 : index
    %c0_19 = arith.constant 0 : index
    %18 = vector.load %arg8[%c0_18, %c0_19] : memref<1x8xf32, #tpu.memory_space<vmem>>, vector<1x8xf32>
    %19 = vector.broadcast %18 : vector<1x8xf32> to vector<64x8xf32>
    %20 = arith.mulf %17, %19 : vector<64x8xf32>
    %21 = vector.shape_cast %20 : vector<64x8xf32> to vector<8x8x8xf32>
    %cst_20 = arith.constant dense<0.000000e+00> : vector<8x8xf32>
    %22 = vector.multi_reduction <add>, %21, %cst_20 [2] : vector<8x8x8xf32> to vector<8x8xf32>
    %c0_21 = arith.constant 0 : index
    %c0_22 = arith.constant 0 : index
    %23 = memref.load %arg9[%c0_21, %c0_22] : memref<1x1xf32, #tpu.memory_space<smem>>
    %24 = vector.broadcast %23 : f32 to vector<8x8xf32>
    %25 = arith.addf %22, %24 : vector<8x8xf32>
    %c0_23 = arith.constant 0 : index
    %c0_24 = arith.constant 0 : index
    %c0_25 = arith.constant 0 : index
    %26 = vector.load %arg2[%c0_23, %c0_24, %c0_25] : memref<1x8x8xf32, #tpu.memory_space<vmem>>, vector<1x8x8xf32>
    %27 = vector.shape_cast %26 : vector<1x8x8xf32> to vector<8x8xf32>
    %cst_26 = arith.constant 0.000000e+00 : f32
    %28 = vector.broadcast %cst_26 : f32 to vector<8x8xf32>
    %29 = arith.cmpf ogt, %27, %28 : vector<8x8xf32>
    %cst_27 = arith.constant -9.000000e+15 : f32
    %30 = vector.broadcast %cst_27 : f32 to vector<8x8xf32>
    %31 = arith.select %29, %25, %30 : vector<8x8xi1>, vector<8x8xf32>
    %cst_28 = arith.constant dense<0xFF800000> : vector<8xf32>
    %32 = vector.multi_reduction <maximumf>, %31, %cst_28 [1] : vector<8x8xf32> to vector<8xf32>
    %33 = vector.shape_cast %32 : vector<8xf32> to vector<8x1xf32>
    %34 = vector.broadcast %33 : vector<8x1xf32> to vector<8x8xf32>
    %35 = arith.subf %31, %34 : vector<8x8xf32>
    %36 = math.exp %35 : vector<8x8xf32>
    %cst_29 = arith.constant dense<0.000000e+00> : vector<8xf32>
    %37 = vector.multi_reduction <add>, %36, %cst_29 [1] : vector<8x8xf32> to vector<8xf32>
    %38 = vector.shape_cast %37 : vector<8xf32> to vector<8x1xf32>
    %39 = tpu.reciprocal %38 {approx = true} : vector<8x1xf32> -> vector<8x1xf32>
    %40 = vector.broadcast %39 : vector<8x1xf32> to vector<8x8xf32>
    %41 = arith.mulf %36, %40 : vector<8x8xf32>
    %cst_30 = arith.constant dense<0.000000e+00> : vector<8x32xf32>
    %42 = tpu.matmul %41, %3, %cst_30 {dimension_numbers = #tpu.dot_dimension_numbers<[1], [0], [0], [1], [0, 0, 1, 1], [], []>} : vector<8x8xf32>, vector<8x32xf32>, vector<8x32xf32> -> vector<8x32xf32>
    %c0_31 = arith.constant 0 : index
    %c0_32 = arith.constant 0 : index
    %43 = vector.load %arg10[%c0_31, %c0_32] : memref<32x32xf32, #tpu.memory_space<vmem>>, vector<32x32xf32>
    %cst_33 = arith.constant dense<0.000000e+00> : vector<8x32xf32>
    %44 = tpu.matmul %42, %43, %cst_33 {dimension_numbers = #tpu.dot_dimension_numbers<[1], [0], [0], [1], [0, 0, 1, 1], [], []>} : vector<8x32xf32>, vector<32x32xf32>, vector<8x32xf32> -> vector<8x32xf32>
    %c0_34 = arith.constant 0 : index
    %c0_35 = arith.constant 0 : index
    %45 = vector.load %arg11[%c0_34, %c0_35] : memref<1x32xf32, #tpu.memory_space<vmem>>, vector<1x32xf32>
    %46 = vector.broadcast %45 : vector<1x32xf32> to vector<8x32xf32>
    %47 = arith.addf %44, %46 : vector<8x32xf32>
    %cst_36 = arith.constant 0.000000e+00 : f32
    %48 = vector.broadcast %cst_36 : f32 to vector<8x32xf32>
    %49 = arith.cmpf ogt, %47, %48 : vector<8x32xf32>
    %50 = math.exp %47 : vector<8x32xf32>
    %cst_37 = arith.constant 1.000000e+00 : f32
    %51 = vector.broadcast %cst_37 : f32 to vector<8x32xf32>
    %52 = arith.subf %50, %51 : vector<8x32xf32>
    %53 = arith.select %49, %47, %52 : vector<8x32xi1>, vector<8x32xf32>
    %c0_38 = arith.constant 0 : index
    %c0_39 = arith.constant 0 : index
    %c0_40 = arith.constant 0 : index
    %54 = vector.load %arg12[%c0_38, %c0_39, %c0_40] : memref<1x8x32xf32, #tpu.memory_space<vmem>>, vector<1x8x32xf32>
    %55 = vector.shape_cast %54 : vector<1x8x32xf32> to vector<8x32xf32>
    %56 = vector.shape_cast %53 : vector<8x32xf32> to vector<1x8x32xf32>
    tpu.vector_store %arg12[%c0_38, %c0_39, %c0_40], %56 {strides = array<i32>} : memref<1x8x32xf32, #tpu.memory_space<vmem>>, vector<1x8x32xf32>,
    return
  }
  func.func @transform_0(%arg0: i32) -> (i32, i32, i32) {
    %c0_i32 = arith.constant 0 : i32
    %c0_i32_0 = arith.constant 0 : i32
    %c0_i32_1 = arith.constant 0 : i32
    return %arg0, %c0_i32, %c0_i32_0 : i32, i32, i32
  }
  func.func @transform_1(%arg0: i32) -> (i32, i32, i32) {
    %c0_i32 = arith.constant 0 : i32
    %c0_i32_0 = arith.constant 0 : i32
    %c0_i32_1 = arith.constant 0 : i32
    return %arg0, %c0_i32, %c0_i32_0 : i32, i32, i32
  }
  func.func @transform_2(%arg0: i32) -> (i32, i32) {
    %c0_i32 = arith.constant 0 : i32
    %c0_i32_0 = arith.constant 0 : i32
    %c0_i32_1 = arith.constant 0 : i32
    return %c0_i32, %c0_i32_0 : i32, i32
  }
  func.func @transform_3(%arg0: i32) -> (i32, i32) {
    %c0_i32 = arith.constant 0 : i32
    %c0_i32_0 = arith.constant 0 : i32
    %c0_i32_1 = arith.constant 0 : i32
    return %c0_i32, %c0_i32_0 : i32, i32
  }
  func.func @transform_4(%arg0: i32) -> (i32, i32) {
    %c0_i32 = arith.constant 0 : i32
    %c0_i32_0 = arith.constant 0 : i32
    %c0_i32_1 = arith.constant 0 : i32
    return %c0_i32, %c0_i32_0 : i32, i32
  }
  func.func @transform_5(%arg0: i32) -> (i32, i32) {
    %c0_i32 = arith.constant 0 : i32
    %c0_i32_0 = arith.constant 0 : i32
    %c0_i32_1 = arith.constant 0 : i32
    return %c0_i32, %c0_i32_0 : i32, i32
  }
  func.func @transform_6(%arg0: i32) -> (i32, i32) {
    %c0_i32 = arith.constant 0 : i32
    %c0_i32_0 = arith.constant 0 : i32
    %c0_i32_1 = arith.constant 0 : i32
    return %c0_i32, %c0_i32_0 : i32, i32
  }
  func.func @transform_7(%arg0: i32) -> (i32, i32) {
    %c0_i32 = arith.constant 0 : i32
    %c0_i32_0 = arith.constant 0 : i32
    %c0_i32_1 = arith.constant 0 : i32
    return %c0_i32, %c0_i32_0 : i32, i32
  }
  func.func @transform_8(%arg0: i32) -> (i32, i32) {
    %c0_i32 = arith.constant 0 : i32
    %c0_i32_0 = arith.constant 0 : i32
    %c0_i32_1 = arith.constant 0 : i32
    return %c0_i32, %c0_i32_0 : i32, i32
  }
  func.func @transform_9(%arg0: i32) -> (i32, i32) {
    %c0_i32 = arith.constant 0 : i32
    %c0_i32_0 = arith.constant 0 : i32
    %c0_i32_1 = arith.constant 0 : i32
    return %c0_i32, %c0_i32_0 : i32, i32
  }
  func.func @transform_10(%arg0: i32) -> (i32, i32) {
    %c0_i32 = arith.constant 0 : i32
    %c0_i32_0 = arith.constant 0 : i32
    %c0_i32_1 = arith.constant 0 : i32
    return %c0_i32, %c0_i32_0 : i32, i32
  }
  func.func @transform_11(%arg0: i32) -> (i32, i32, i32) {
    %c0_i32 = arith.constant 0 : i32
    %c0_i32_0 = arith.constant 0 : i32
    %c0_i32_1 = arith.constant 0 : i32
    return %arg0, %c0_i32, %c0_i32_0 : i32, i32, i32
  }
}

</mosaic_0001>

<bundles_post_ra>
// kernel: tpu_custom_call.1
= control target key start
LH: loop header
LB: loop body
LE: loop exit
PB: predicated region body
PF: predicated region fallthrough
CT: control target
= control target key end

     0   :  { %s1905_s0 = inlined_call_operand.vmem [shape: f32[2,8,16], index: 0, kind: input, shape index: {}]   ;;  %s1906_s1 = inlined_call_operand.vmem [shape: f32[2,8,8], index: 1, kind: input, shape index: {}]   ;;  %s1907_s2 = inlined_call_operand.vmem [shape: f32[16,32], index: 2, kind: input, shape index: {}]   ;;  %s1908_s3 = inlined_call_operand.vmem [shape: f32[32,8], index: 3, kind: input, shape index: {}]   ;;  %s1909_s4 = inlined_call_operand.vmem [shape: f32[32,8], index: 4, kind: input, shape index: {}]   ;;  %s1910_s5 = inlined_call_operand.vmem [shape: f32[64,8], index: 5, kind: input, shape index: {}]   ;;  %s1911_s6 = inlined_call_operand.vmem [shape: f32[64,8], index: 6, kind: input, shape index: {}]   ;;  %s1912_s7 = inlined_call_operand.vmem [shape: f32[1,8], index: 7, kind: input, shape index: {}]   ;;  %s1913_s8 = inlined_call_operand.<no memory space> [shape: f32[1,1], index: 8, kind: input, shape index: {}]   ;;  %s1914_s9 = inlined_call_operand.vmem [shape: f32[32,32], index: 9, kind: input, shape index: {}]   ;;  %s1915_s10 = inlined_call_operand.vmem [shape: f32[1,32], index: 10, kind: input, shape index: {}]   ;;  %s1916_s11 = inlined_call_operand.hbm [shape: f32[2,8,32], index: 11, kind: output, shape index: {}]  }
   0x1   :  { %16 = sst [smem:[#allocation2]] %s1913_s8 }
   0x2   :  { %17 = vsyncpa [#allocation4], 0 }
   0x3   :  { %19 = vsyncpa [#allocation4 + $0x1], 0  ;;  %s1650_s19 = smov 0   ;;  %s1652_s20 = smov 0  }
   0x4   :  { %s1654_s21 = smov 0   ;;  %s1656_s22 = smov 0  }
   0x5 LB: > { %s1671_s8 = sadd.s32 4294967295, %s1581_s22   ;;  %s1296_s23 = sadd.s32 4294967294, %s1581_s22   ;;  %s1581_s22 = sphi %s1656_s22, %s1922_s22   ;;  %s1577_s21 = sphi %s1654_s21, %s1921_s21   ;;  %s1573_s20 = sphi %s1652_s20, %s1920_s20   ;;  %s1569_s19 = sphi %s1650_s19, %s1919_s19  }
   0x6   : > { %s1675_s24 = sadd.s32 1, %s1581_s22   ;;  %s273_s25 = sadd.s32 1, %s1577_s21 }
   0x7   : > { %s270_s26 = ssub.s32 %s1581_s22, %s1675_s24  ;;  %p283_p0 = scmp.ne.s32.totalorder %s1577_s21, %s1573_s20 }
   0x8   : > { %p271_p1 = scmp.eq.s32.totalorder %s270_s26, 0  ;;  %p284_p2 = scmp.eq.s32.totalorder %s1671_s8, 1 }
   0x9   : > { %p289_p3 = scmp.ne.s32.totalorder %s1573_s20, %s1569_s19  ;;  %p290_p4 = scmp.eq.s32.totalorder %s1296_s23, 1 }
   0xa   : > { %s1686_s27 = scalar_select %p271_p1, %s1577_s21, %s273_s25  }
   0xb   : > { %p1688_p5 = por %p284_p2, %p283_p0  ;;  %p1692_p6 = por %p290_p4, %p289_p3 }
   0xc   : > { %p1299_p7 = scmp.ge.s32.totalorder %s1581_s22, 1  ;;  %p349_p8 = scmp.lt.s32.totalorder %s1581_s22, 3 }
   0xe   : > { %p350_p9 = pnand %p1299_p7, %p349_p8 }
   0xf   : > { %v401_v0 = vld [vmem:[%s1907_s2] sm:$0xff] (!%p350_p9)  ;;  %v402_v1 = vld [vmem:[%s1907_s2 + $0x8] sm:$0xff] (!%p350_p9)  ;;  %p392_p10 = scmp.lt.s32.totalorder (!%p350_p9), %s1671_s8, 1  ;;  %v1583_v2 = vmov (!%p350_p9), 0.0|0.0   ;;  %vm1584_vm0 = vmmov (!%p350_p9), 0   ;;  %v1585_v4 = vmov (!%p350_p9), 0.0  }
  0x10   : > { %353 = sbr.rel (%p350_p9) target bundleno = 1630 (0x65e), region = 64  ;;  %1442 = vmatprep.subr.bf16.mxu0 (!%p350_p9), %v1583_v2  ;;  %v1443_v3 = vpack.c.bf16 (!%p350_p9), %v402_v1, %v401_v0  ;;  %1373 = vmatprep.mubr.msk.f32.mxu0 (!%p350_p9), %vm1584_vm0, %v1585_v4  ;;  %v477_v5 = vld [vmem:[%s1908_s3] sm:$0xff] (!%p350_p9)  ;;  %v478_v6 = vld [vmem:[%s1908_s3 + $0x8] sm:$0xff] (!%p350_p9)  ;;  %vm403_vm1 = vcmask (!%p350_p9), 130048   ;;  %v479_v8 = vld [vmem:[%s1908_s3 + $0x10] sm:$0xff] (!%p350_p9)  ;;  %vm481_vm2 = vcmask (!%p350_p9), 261120  }
  0x11   : > { %v1446_v7 = vpack.c.bf16 (!%p350_p9), %v478_v6, %v477_v5  ;;  %v480_v9 = vld [vmem:[%s1908_s3 + $0x18] sm:$0xff] (!%p350_p9)  ;;  %v555_v12 = vld [vmem:[%s1909_s4] sm:$0xff] (!%p350_p9)  ;;  %v556_v13 = vld [vmem:[%s1909_s4 + $0x8] sm:$0xff] (!%p350_p9)  ;;  %vm645_vm3 = vcmask (!%p350_p9), 64512   ;;  %s967_s14 = sld [smem:[#allocation2]] (!%p350_p9)  ;;  %vm1021_vm12 = vcmask (!%p350_p9), 1041409  }
  0x12   : > { %1444 = vmatpush3.bf16.msra.mxu0 (!%p350_p9), %v1443_v3  ;;  %v1449_v11 = vpack.c.bf16 (!%p350_p9), %v480_v9, %v479_v8  ;;  %v1452_v14 = vpack.c.bf16 (!%p350_p9), %v556_v13, %v555_v12  ;;  %v557_v15 = vld [vmem:[%s1909_s4 + $0x10] sm:$0xff] (!%p350_p9)  ;;  %v558_v16 = vld [vmem:[%s1909_s4 + $0x18] sm:$0xff] (!%p350_p9)  ;;  %v637_v20 = vld [vmem:[%s1911_s6] sm:$0xff] (!%p350_p9)  ;;  %vm1023_vm13 = vcmask (!%p350_p9), 1042434   ;;  %vm1025_vm14 = vcmask (!%p350_p9), 1043459   ;;  %s1586_s15 = smov (!%p350_p9), [#allocation3]  }
  0x13   : > { %1445 = vmatprep.subr.bf16.mxu0 (!%p350_p9), %v1583_v2  ;;  %v1455_v19 = vpack.c.bf16 (!%p350_p9), %v558_v16, %v557_v15  ;;  %1400 = vmatprep.mubr.msk.f32.mxu1 (!%p350_p9), %vm645_vm3, %v637_v20  ;;  %v638_v24 = vld [vmem:[%s1911_s6 + $0x8] sm:$0xff] (!%p350_p9)  ;;  %v639_v26 = vld [vmem:[%s1911_s6 + $0x10] sm:$0xff] (!%p350_p9)  ;;  %v640_v27 = vld [vmem:[%s1911_s6 + $0x18] sm:$0xff] (!%p350_p9)  ;;  %vm1027_vm15 = vcmask (!%p350_p9), 1044484   ;;  %s1523_s16 = sshll.u32 (!%p350_p9), %s1586_s15, 4  ;;  %s1524_s16 = int_to_ptr.vmem [resolvable:$false] %s1523_s16 }
  0x14   : > { %v641_v28 = vld [vmem:[%s1911_s6 + $0x20] sm:$0xff] (!%p350_p9)  ;;  %v642_v29 = vld [vmem:[%s1911_s6 + $0x28] sm:$0xff] (!%p350_p9)  ;;  %v643_v30 = vld [vmem:[%s1911_s6 + $0x30] sm:$0xff] (!%p350_p9) }
  0x15   : > { %v644_v31 = vld [vmem:[%s1911_s6 + $0x38] sm:$0xff] (!%p350_p9)  ;;  %v629_v32 = vld [vmem:[%s1910_s5] sm:$0xff] (!%p350_p9)  ;;  %v630_v33 = vld [vmem:[%s1910_s5 + $0x8] sm:$0xff] (!%p350_p9) }
  0x16   : > { %v631_v34 = vld [vmem:[%s1910_s5 + $0x10] sm:$0xff] (!%p350_p9)  ;;  %v632_v35 = vld [vmem:[%s1910_s5 + $0x18] sm:$0xff] (!%p350_p9)  ;;  %v633_v36 = vld [vmem:[%s1910_s5 + $0x20] sm:$0xff] (!%p350_p9) }
  0x17   : > { %s1715_s23 = scalar_select %p392_p10, %s1671_s8, 1  ;;  %v634_v37 = vld [vmem:[%s1910_s5 + $0x28] sm:$0xff]  ;;  %v635_v38 = vld [vmem:[%s1910_s5 + $0x30] sm:$0xff]  ;;  %v636_v39 = vld [vmem:[%s1910_s5 + $0x38] sm:$0xff] }
  0x18   : > { %v1322_v43 = vld [vmem:[%s1912_s7] ss:$0 sm:$0xff] }
  0x19   : > { %s1301_s25 = sshll.u32 %s1715_s23, 3 }
  0x1a   : > { %s395_s12 = scalar_lea.vmem %s1905_s0, %s1301_s25  ;;  %s399_s17 = scalar_lea.vmem %s1906_s1, %s1301_s25 }
  0x1b   : > { %v400_v10 = vld [vmem:[%s395_s12] sm:$0xff]  ;;  %s1328_s25 = sshll.u32 %s1671_s8, 7 }
  0x1c   : > { %1374 = vmatmul.mubr.msk.f32.vlgmr.msra.gmra.mrb[0].mxu0 %vm403_vm1, %v400_v10  ;;  %vm1029_vm1 = vcmask 1045509   ;;  %s1862_s13 = scalar_lea.hbm %s1916_s11, %s1328_s25 }
  0x1d   : > { %1447 = vmatpush3.bf16.msra.mxu0 %v1446_v7  ;;  %1384 = vmatprep.mubr.msk.f32.mxu0 %vm1584_vm0, %v1585_v4 }
  0x1e   : > { %1448 = vmatprep.subr.bf16.mxu0 %v1583_v2 }
  0x21   : > { %1450 = vmatpush3.bf16.msra.mxu0 %v1449_v11 }
  0x22   : > { %1451 = vmatprep.subr.bf16.mxu0 %v1583_v2 }
  0xef   : > { %v473_v17 = vpop.f32.mrb[0].mxu0 }
  0xf0   : > { %v1375_v18 = vpop.f32.mrb[1].mxu0  ;;  %1385 = vmatmul.mubr.msk.f32.vlgmr.msra.gmra.mrb[2].mxu0 %vm481_vm2, %v473_v17 }
  0xf1   : > { %1453 = vmatpush3.bf16.msra.mxu0 %v1452_v14  ;;  %1395 = vmatprep.mubr.msk.f32.mxu0 %vm1584_vm0, %v1585_v4 }
  0xf2   : > { %1454 = vmatprep.subr.bf16.mxu0 %v1583_v2 }
  0xf5   : > { %1456 = vmatpush3.bf16.msra.mxu0 %v1455_v19  ;;  %v987_v19 = vlaneseq }
  0xf6   : > { %1426 = vmatprep.subr.mxu0 %v1585_v4 }
  0xf8   : > { %1396 = vmatmul.mubr.msk.f32.vlgmr.msra.gmra.mrb[4].mxu0 %vm481_vm2, %v473_v17 }
  0xf9   : > { %1427 = vmatpush3.msra.mxu0 %v473_v17  ;;  %1428 = vmatprep.mubr.msk.f32.mxu0 %vm1584_vm0, %v1585_v4 }
  0xfa   : > { %1457 = vmatprep.subr.bf16.mxu0 %v1583_v2 }
 0x1c3   : > { %v551_v21 = vpop.f32.mrb[2].mxu0 }
 0x1c4   : > { %v1386_v22 = vpop.f32.mrb[3].mxu0 }
 0x1c5   : > { %v990_v22 = vshrl.u32 %v987_v19, 7 }
 0x1cb   : > { %v625_v23 = vpop.f32.mrb[4].mxu0 }
 0x1cc   : > { %v1397_v25 = vpop.f32.mrb[5].mxu0  ;;  %1398 = vmatprep.subr.mxu1 %v625_v23 }
 0x1cd   : > { %1399 = vmatpush3.msra.mxu1 %v625_v23  ;;  %v968_v23 = vstv %s967_s14 }
 0x1ce   : > { %1401 = vmatmul.mubr.msk.f32.vlgmr.msra.gmra.mrb[0].mxu1 %vm645_vm3, %v638_v24  ;;  %1412 = vmatprep.subr.mxu1 %v551_v21 }
 0x1cf   : > { %1413 = vmatpush3.msra.mxu1 %v551_v21  ;;  %1403 = vmatprep.mubr.msk.f32.mxu1 %vm645_vm3, %v639_v26  ;;  %v988_v21 = vand.u32 127, %v987_v19 }
 0x1d2   : > { %1404 = vmatmul.mubr.msk.f32.gmra.mrb[2].mxu1 %vm645_vm3, %v640_v27  ;;  %v991_v27 = vsub.s32 %v988_v21, %v990_v22 }
 0x1d3   : > { %1406 = vmatprep.mubr.msk.f32.mxu1 %vm645_vm3, %v641_v28 }
 0x1d6   : > { %1407 = vmatmul.mubr.msk.f32.gmra.mrb[4].mxu1 %vm645_vm3, %v642_v29 }
 0x1d7   : > { %1409 = vmatprep.mubr.msk.f32.mxu1 %vm645_vm3, %v643_v30 }
 0x1da   : > { %1410 = vmatmul.mubr.msk.f32.gmra.mrb[6].mxu1 %vm645_vm3, %v644_v31 }
 0x1db   : > { %1414 = vmatprep.mubr.msk.f32.mxu1 %vm645_vm3, %v629_v32 }
 0x1de   : > { %1415 = vmatmul.mubr.msk.f32.vlgmr.msra.gmra.mrb[0].mxu1 %vm645_vm3, %v630_v33 }
 0x1df   : > { %1417 = vmatprep.mubr.msk.f32.mxu1 %vm645_vm3, %v631_v34 }
 0x1e2   : > { %1418 = vmatmul.mubr.msk.f32.gmra.mrb[2].mxu1 %vm645_vm3, %v632_v35 }
 0x1e3   : > { %1420 = vmatprep.mubr.msk.f32.mxu1 %vm645_vm3, %v633_v36 }
 0x1e6   : > { %1421 = vmatmul.mubr.msk.f32.gmra.mrb[4].mxu1 %vm645_vm3, %v634_v37 }
 0x1e7   : > { %1423 = vmatprep.mubr.msk.f32.mxu1 %vm645_vm3, %v635_v38 }
 0x1ea   : > { %1424 = vmatmul.mubr.msk.f32.gmra.mrb[6].mxu1 %vm645_vm3, %v636_v39 }
 0x2b1   : > { %v1416_v40 = vpop.f32.mrb[0].mxu1 }
 0x2b2   : > { %vm905_vm4 = vcmp.gt.f32.partialorder %v1416_v40, 0.0  ;;  %v913_v41 = vmul.f32 0.01, %v1416_v40  ;;  %v865_v42 = vpop.f32.mrb[1].mxu1 }
 0x2b3   : > { %vm904_vm5 = vcmp.gt.f32.partialorder %v865_v42, 0.0  ;;  %v912_v44 = vmul.f32 0.01, %v865_v42 }
 0x2b4   : > { %v921_v45 = vsel %vm905_vm4, %v1416_v40, %v913_v41  ;;  %vm1031_vm4 = vcmask 1046534  }
 0x2b5   : > { %v1419_v46 = vpop.f32.mrb[2].mxu1  ;;  %v936_v47 = vmul.f32 %v1322_v43, %v921_v45  ;;  %v920_v48 = vsel %vm904_vm5, %v865_v42, %v912_v44  ;;  %vm1033_vm5 = vcmask 1047559  }
 0x2b6   : > { %vm907_vm6 = vcmp.gt.f32.partialorder %v1419_v46, 0.0  ;;  %v915_v49 = vmul.f32 0.01, %v1419_v46  ;;  %v875_v50 = vpop.f32.mrb[3].mxu1  ;;  %v935_v51 = vmul.f32 %v1322_v43, %v920_v48 }
 0x2b7   : > { %vm906_vm7 = vcmp.gt.f32.partialorder %v875_v50, 0.0  ;;  %v914_v52 = vmul.f32 0.01, %v875_v50  ;;  %v946_v53 = vsel %vm645_vm3, %v936_v47, 0.0 }
 0x2b8   : > { %947 = vadd.xlane.f32.xlu0 %v946_v53  ;;  %v923_v54 = vsel %vm907_vm6, %v1419_v46, %v915_v49  ;;  %v943_v60 = vsel %vm645_vm3, %v935_v51, 0.0 }
 0x2b9   : > { %v1422_v55 = vpop.f32.mrb[4].mxu1  ;;  %v938_v56 = vmul.f32 %v1322_v43, %v923_v54  ;;  %v922_v57 = vsel %vm906_vm7, %v875_v50, %v914_v52  ;;  %v977_v50 = vld [vmem:[%s399_s17] sm:$0xff]  ;;  %s389_s17 = sand.u32 1, %s1573_s20  }
 0x2ba   : > { %vm909_vm8 = vcmp.gt.f32.partialorder %v1422_v55, 0.0  ;;  %v917_v58 = vmul.f32 0.01, %v1422_v55  ;;  %v885_v59 = vpop.f32.mrb[5].mxu1  ;;  %v937_v63 = vmul.f32 %v1322_v43, %v922_v57  ;;  %vm978_vm6 = vcmp.gt.f32.partialorder %v977_v50, 0.0  ;;  %s1300_s23 = sshll.u32 %s389_s17, 3 }
 0x2bb   : > { %vm908_vm9 = vcmp.gt.f32.partialorder %v885_v59, 0.0  ;;  %v916_v61 = vmul.f32 0.01, %v885_v59  ;;  %v952_v62 = vsel %vm645_vm3, %v938_v56, 0.0  ;;  %s391_s18 = scalar_lea.vmem [#allocation3], %s1300_s23  ;;  %s1212_s14 = scalar_lea.sflag [#allocation4], %s389_s17 }
 0x2bc   : > { %944 = vadd.xlane.f32.xlu0 %v943_v60  ;;  %953 = vadd.xlane.f32.xlu1 %v952_v62  ;;  %v925_v0 = vsel %vm909_vm8, %v1422_v55, %v917_v58  ;;  %v949_v9 = vsel %vm645_vm3, %v937_v63, 0.0  ;;  %s1225_s26 = sshll.u32 %s391_s18, 4  ;;  %s1525_s23 = scalar_lea.vmem %s1524_s16, 256  ;;  %s1864_s26 = int_to_ptr.vmem [resolvable:$true] %s1225_s26 }
 0x2bd   : > { %v1425_v1 = vpop.f32.mrb[6].mxu1  ;;  %v924_v3 = vsel %vm908_vm9, %v885_v59, %v916_v61  ;;  %v940_v10 = vmul.f32 %v1322_v43, %v925_v0  ;;  %v1121_v0 = vld [vmem:[%s1914_s9] sm:$0xff]  ;;  %s1519_s8 = scalar_lea.vmem %s1864_s26, 128  ;;  %p1526_p0 = scmp.lt.s32.totalorder %s1864_s26, %s1524_s16 }
 0x2be   : > { %vm911_vm10 = vcmp.gt.f32.partialorder %v1425_v1, 0.0  ;;  %v919_v5 = vmul.f32 0.01, %v1425_v1  ;;  %v895_v6 = vpop.f32.mrb[7].mxu1  ;;  %v939_v7 = vmul.f32 %v1322_v43, %v924_v3  ;;  %p1520_p11 = scmp.ne.s32.totalorder %s1864_s26, %s1519_s8  ;;  %p1527_p1 = scmp.lt.s32.totalorder %s1525_s23, %s1519_s8 }
 0x2bf   : > { %vm910_vm11 = vcmp.gt.f32.partialorder %v895_v6, 0.0  ;;  %v918_v8 = vmul.f32 0.01, %v895_v6  ;;  %v958_v15 = vsel %vm645_vm3, %v940_v10, 0.0 }
 0x2c0   : > { %950 = vadd.xlane.f32.xlu1 %v949_v9  ;;  %v955_v11 = vsel %vm645_vm3, %v939_v7, 0.0  ;;  %v927_v12 = vsel %vm911_vm10, %v1425_v1, %v919_v5  ;;  %v1122_v1 = vld [vmem:[%s1914_s9 + $0x8] sm:$0xff]  ;;  %v1123_v7 = vld [vmem:[%s1914_s9 + $0x10] sm:$0xff]  ;;  %p1521_p12 = pnand %p1520_p11, %p1688_p5  ;;  %p1528_p2 = por %p1527_p1, %p1526_p0 }
 0x2c1   : > { %v926_v13 = vsel %vm910_vm11, %v895_v6, %v918_v8  ;;  %956 = vadd.xlane.f32.xlu0 %v955_v11  ;;  %v942_v16 = vmul.f32 %v1322_v43, %v927_v12  ;;  %v1458_v5 = vpack.c.bf16 %v1122_v1, %v1121_v0  ;;  %v1124_v8 = vld [vmem:[%s1914_s9 + $0x18] sm:$0xff]  ;;  %v1324_v12 = vld [vmem:[%s1915_s10] ss:$0 sm:$0xff] }
 0x2c2   : > { %v941_v14 = vmul.f32 %v1322_v43, %v926_v13  ;;  %v1461_v9 = vpack.c.bf16 %v1124_v8, %v1123_v7  ;;  %p1522_p13 = pneg %p1521_p12 }
 0x2c3   : > { %v964_v18 = vsel %vm645_vm3, %v942_v16, 0.0 }
 0x2c4   : > { %959 = vadd.xlane.f32.xlu1 %v958_v15  ;;  %v961_v17 = vsel %vm645_vm3, %v941_v14, 0.0  ;;  %p1529_p3 = pnand %p1528_p2, %p1522_p13 }
 0x2c5   : > { %962 = vadd.xlane.f32.xlu0 %v961_v17 }
 0x2c8   : > { %965 = vadd.xlane.f32.xlu1 %v964_v18 }
 0x345   : > { %v948_v20 = vpop.xlane.xlu0 %947 }
 0x346   : > { %v970_v28 = vadd.f32 %v968_v23, %v948_v20 }
 0x348   : > { %v996_v34 = vrot.slane %v970_v28, %v991_v27 }
 0x349   : > { %v945_v24 = vpop.xlane.xlu0 %944  ;;  %v954_v25 = vpop.xlane.xlu1 %953 }
 0x34a   : > { %v969_v26 = vadd.f32 %v968_v23, %v945_v24  ;;  %v972_v30 = vadd.f32 %v968_v23, %v954_v25 }
 0x34c   : > { %v992_v29 = vrot.slane %v969_v26, %v991_v27  ;;  %v1004_v38 = vrot.slane %v972_v30, %v991_v27 }
 0x34d   : > { %v951_v31 = vpop.xlane.xlu1 %950 }
 0x34e   : > { %v971_v32 = vadd.f32 %v968_v23, %v951_v31  ;;  %v957_v33 = vpop.xlane.xlu0 %956  ;;  %v1022_v37 = vsel %vm1021_vm12, %v996_v34, %v992_v29 }
 0x34f   : > { %v973_v35 = vadd.f32 %v968_v23, %v957_v33 }
 0x350   : > { %v1000_v36 = vrot.slane %v971_v32, %v991_v27 }
 0x351   : > { %v1008_v39 = vrot.slane %v973_v35, %v991_v27  ;;  %v960_v40 = vpop.xlane.xlu1 %959 }
 0x352   : > { %v1024_v41 = vsel %vm1023_vm13, %v1000_v36, %v1022_v37  ;;  %v974_v42 = vadd.f32 %v968_v23, %v960_v40  ;;  %v963_v43 = vpop.xlane.xlu0 %962 }
 0x353   : > { %v1026_v44 = vsel %vm1025_vm14, %v1004_v38, %v1024_v41  ;;  %v975_v45 = vadd.f32 %v968_v23, %v963_v43 }
 0x354   : > { %v1028_v46 = vsel %vm1027_vm15, %v1008_v39, %v1026_v44  ;;  %v1012_v47 = vrot.slane %v974_v42, %v991_v27 }
 0x355   : > { %v1016_v48 = vrot.slane %v975_v45, %v991_v27  ;;  %v966_v49 = vpop.xlane.xlu1 %965 }
 0x356   : > { %v976_v51 = vadd.f32 %v968_v23, %v966_v49  ;;  %v1030_v52 = vsel %vm1029_vm1, %v1012_v47, %v1028_v46 }
 0x357   : > { %v1032_v54 = vsel %vm1031_vm4, %v1016_v48, %v1030_v52 }
 0x358   : > { %v1020_v53 = vrot.slane %v976_v51, %v991_v27 }
 0x35a   : > { %v1034_v55 = vsel %vm1033_vm5, %v1020_v53, %v1032_v54 }
 0x35b   : > { %v1036_v56 = vsel %vm978_vm6, %v1034_v55, -9e+15 }
 0x35c   : > { %v1037_v57 = vsel %vm645_vm3, %v1036_v56, -inf }
 0x35d   : > { %1038 = vmax.xlane.f32.xlu0 %v1037_v57 }
 0x3ea   : > { %v1039_v58 = vpop.xlane.xlu0 %1038 }
 0x3eb   : > { %v1040_v59 = vsub.f32 %v1036_v56, %v1039_v58 }
 0x3ed   : > { %v1041_v60 = vmul.f32 1.442695, %v1040_v59 }
 0x3ef   : > { %1513 = vpow2.f32 %v1041_v60 }
 0x3f9   : > { %v1514_v61 = vpop.eup %1513 }
 0x3fa   : > { %v1043_v62 = vsel %vm645_vm3, %v1514_v61, 0.0 }
 0x3fb   : > { %1044 = vadd.xlane.f32.xlu1 %v1043_v62 }
 0x488   : > { %v1045_v63 = vpop.xlane.xlu1 %1044 }
 0x489   : > { %1515 = vrcp.f32 %v1045_v63 }
 0x493   : > { %v1516_v3 = vpop.eup %1515 }
 0x494   : > { %v1047_v6 = vmul.f32 %v1516_v3, %v1514_v61 }
 0x496   : > { %1429 = vmatmul.mubr.msk.f32.vlgmr.msra.gmra.mrb[6].mxu0 %vm645_vm3, %v1047_v6 }
 0x497   : > { %1459 = vmatpush3.bf16.msra.mxu0 %v1458_v5  ;;  %1439 = vmatprep.mubr.msk.f32.mxu0 %vm1584_vm0, %v1585_v4 }
 0x498   : > { %1460 = vmatprep.subr.bf16.mxu0 %v1583_v2 }
 0x49b   : > { %1462 = vmatpush3.bf16.msra.mxu0 %v1461_v9 }
 0x569   : > { %v1117_v10 = vpop.f32.mrb[6].mxu0 }
 0x56a   : > { %v1430_v11 = vpop.f32.mrb[7].mxu0  ;;  %1440 = vmatmul.mubr.msk.f32.vlgmr.msra.gmra.mrb[8].mxu0 %vm481_vm2, %v1117_v10 }
 0x63d   : > { %v1201_v13 = vpop.f32.mrb[8].mxu0 }
 0x63e   : > { %v1202_v14 = vadd.f32 %v1324_v12, %v1201_v13  ;;  %v1441_v15 = vpop.f32.mrb[9].mxu0 }
 0x640   : > { %v1206_v16 = vmul.f32 1.442695, %v1202_v14  ;;  %vm1205_vm0 = vcmp.gt.f32.partialorder %v1202_v14, 0.0 }
 0x642   : > { %1517 = vpow2.f32 %v1206_v16 }
 0x64c   : > { %v1518_v2 = vpop.eup %1517 }
 0x64d   : > { %v1326_v4 = vadd.f32 -1.0, %v1518_v2 }
 0x64f   : > { %v1209_v17 = vsel %vm1205_vm0, %v1202_v14, %v1326_v4 }
 0x650   : > { %1210 = vst.msk [vmem:[%s391_s18] sm:$0xff] %vm481_vm2, %v1209_v17 }
 0x651   : > { %1532 = shalt.err (!%p1529_p3)
}
 0x652   : > { %s1533_s17 = scalar_lea.hbm %s1862_s13, 128  ;;  %s1537_s30 = scalar_lea.hbm %s1916_s11, 256 }
 0x653   : > { %p1534_p4 = scmp.ne.s32.totalorder %s1862_s13, %s1533_s17  ;;  %p1538_p9 = scmp.lt.u32.totalorder %s1862_s13, %s1916_s11 }
 0x654   : > { %p1539_p10 = scmp.lt.u32.totalorder %s1537_s30, %s1533_s17  ;;  %p1541_p12 = scmp.lt.u32.totalorder %s1533_s17, %s1862_s13 }
 0x655   : > { %p1535_p7 = pnand %p1534_p4, %p1688_p5 }
 0x656   : > { %p1540_p11 = por %p1539_p10, %p1538_p9 }
 0x657   : > { %p1536_p8 = pneg %p1535_p7 }
 0x658   : > { %p1542_p13 = por %p1541_p12, %p1540_p11 }
 0x65a   : > { %p1543_p0 = pnand %p1542_p13, %p1536_p8 }
 0x65c   : > { %1546 = shalt.err (!%p1543_p0)
}
 0x65d   : > { %1471 = dma.vmem_to_hbm [thread:$0]  (%p1688_p5), %s1864_s26, 128, %s1862_s13, %s1212_s14  }
 0x65e PF: > { %p1477_p1 = scmp.ge.s32.totalorder %s1581_s22, 2  ;;  %s1237_s8 = sand.u32 1, %s1569_s19  }
 0x65f   : > { %s1238_s16 = scalar_lea.sflag [#allocation4], %s1237_s8 }
 0x660   : > { %p1474_p2 = pnand %p1477_p1, %p1692_p6 }
 0x662   : > { %1564 = dma.done.wait (!%p1474_p2), %s1238_s16, 128  }
 0x663   : > { %1566 = vsyncadd (!%p1474_p2), %s1238_s16, 4294967168  ;;  %p22_p3 = scmp.ge.s32.totalorder %s1675_s24, 4   ;;  %s1919_s19 = smov %s1573_s20 }
 0x664   : > { %s1920_s20 = smov %s1577_s21  ;;  %s1921_s21 = smov %s1686_s27 }
 0x665   : > { %s1922_s22 = smov %s1675_s24  ;;  %24 = sbr.rel (!%p22_p3) target bundleno = 5 (0x5), region = 102 }
 0x66c   :  { %1243 = vsyncpa [#allocation4], 1 }
 0x66d   :  { %1245 = vsyncpa [#allocation4 + $0x1], 1 }

</bundles_post_ra>
